<compile_context>
chip_gen: v7x
topology: tpu7x:2x2x1
jax: 0.10.0
libtpu: 0.0.40
codegen_flags: <defaults>
</compile_context>

<pallas_src>
import jax
import jax.numpy as jnp
from jax.experimental import pallas as pl
from jax.experimental.pallas import tpu as pltpu


def _round_up(x, m):
    return ((x + m - 1) // m) * m


def _cdiv(a, b):
    return (a + b - 1) // b


def _vmem_budget_and_limit():
    """Per-generation VMEM sizing (v5e/v6e: 128 MiB physical, v7x: 64 MiB/TC)."""
    try:
        cap = int(pltpu.get_tpu_info().vmem_capacity_bytes)
    except Exception:
        cap = 64 * 1024 * 1024  # conservative fallback (v7x per-core VMEM)
    budget = min(int(cap * 0.6), 64 * 1024 * 1024)   # working-set target
    limit = min(int(cap * 0.8), 100 * 1024 * 1024)   # scoped-VMEM cap (if needed)
    return budget, limit


def _nd_head_kernel(x_ref, a_ref, c_ref, b_ref, o_ref, t_ref):
    """One (batch-tile i, class-tile j) step:  out = (x[i] @ A) @ C[:, j] + b[j].

    x_ref: (TB, D)   activation tile (streaming dtype, no upcast)
    a_ref: (D, Rp)   rank factor A (constant over the grid, single-buffered)
    c_ref: (Rp, TN)  rank factor C, tiled along the class axis
    b_ref: (1, TN)   effective bias (kept f32)
    o_ref: (TB, TN)  output tile
    t_ref: (TB, Rp)  VMEM scratch holding x @ A for the current batch tile
    """
    # First (rank) GEMM: once per batch tile, at the first class-tile step.
    @pl.when(pl.program_id(1) == 0)
    def _():
        t_ref[...] = jnp.dot(
            x_ref[...], a_ref[...], preferred_element_type=jnp.float32
        ).astype(t_ref.dtype)

    # Second GEMM, f32 accumulation + f32 bias add; cast only at the store.
    acc = jnp.dot(t_ref[...], c_ref[...], preferred_element_type=jnp.float32)
    o_ref[...] = (acc + b_ref[...]).astype(o_ref.dtype)


def nd_classification_head(x, params, *, tb_max=1024, tn_max=2048):
    """Forward pass of NdClassificationHead as one Pallas TPU kernel.

    Semantically identical to
        x3  = x.reshape(B, D // 8, 8)
        y   = einsum('bdk,hd->bhk', x3, w1) + b1[:, None]
        z   = einsum('bhk,gk->bhg', y,  w2) + b2
        out = z.reshape(B, -1) @ w3.T + b3
    executed as two chained GEMMs via the head's rank-4 factorisation.
    """
    w1, b1, w2, b2, w3, b3 = params
    B, D = x.shape
    assert D % 8 == 0
    H1, H2 = w1.shape[0], w2.shape[0]
    R = H1 * H2                       # true rank of the head (= 4)
    O = w3.shape[0]

    cdt = x.dtype                     # streaming/compute dtype (no upcast)
    itemsize = jnp.dtype(cdt).itemsize
    out_itemsize = itemsize
    sub = max(8, 32 // itemsize)      # sublane multiple: 8 (f32), 16 (bf16)

    # ---- Rank factorisation (O(D*R + R*O); the dense fold would be O(D*R*O)).
    #   A[d*8 + k, h*H2 + g] = w1[h, d] * w2[g, k]
    #   b_mid[h*H2 + g]      = b1[h] * sum_k w2[g, k] + b2[g]
    #   out = (x @ A + b_mid) @ w3.T + b3 = x @ A @ C + b_eff
    a_fac = jnp.einsum('hd,gk->dkhg', w1, w2).reshape(D, R)
    b_mid = (b1[:, None] * jnp.sum(w2, axis=1)[None, :] + b2[None, :]).reshape(R)
    c_fac = w3.T                                          # (R, O)
    b_eff = b_mid @ c_fac + b3                            # (O,), stays f32

    # ---- Lane-dense padding: rank dim -> one 128-lane tile, classes -> TN tiles.
    Rp = _round_up(R, 128)
    TN = min(_round_up(O, 128), _round_up(tn_max, 128))
    Op = _round_up(O, TN)

    a_pad = jnp.pad(a_fac, ((0, 0), (0, Rp - R))).astype(cdt)        # (D, Rp)
    c_pad = jnp.pad(c_fac, ((0, Rp - R), (0, Op - O))).astype(cdt)   # (Rp, Op)
    b_pad = jnp.pad(b_eff, ((0, Op - O),)).astype(jnp.float32).reshape(1, Op)

    # ---- Batch handling: never pad along D; pad the batch only in the
    # degenerate B < sublane-tile case (trivial copy).  Otherwise the grid is
    # cdiv(B, TB) and Pallas masks the ragged last batch tile.
    if B < sub:
        xp = jnp.pad(x, ((0, sub - B), (0, 0)))
        Bp = sub
    else:
        xp = x
        Bp = B

    # ---- Batch tile size vs. the per-generation VMEM budget.
    budget, vmem_limit = _vmem_budget_and_limit()

    def step_bytes(tb):
        return (2 * tb * D * itemsize          # x tile (double-buffered)
                + 1 * D * Rp * itemsize        # A (constant, single-buffered)
                + 2 * Rp * TN * itemsize       # C tile
                + 2 * TN * 4                   # bias tile (f32)
                + 2 * tb * TN * out_itemsize   # output tile
                + tb * Rp * itemsize)          # scratch (x @ A)

    TB = min(_round_up(tb_max, sub), _round_up(Bp, sub))
    while TB > sub and step_bytes(TB) > budget:
        TB -= sub
    # Megacore (v7x): give the 'parallel' batch axis >= 2 tiles when possible.
    if Bp > 2 * sub:
        while _cdiv(Bp, TB) < 2:
            nt = max(sub, _round_up(TB // 2, sub))
            if nt == TB:
                break
            TB = nt

    grid_b = _cdiv(Bp, TB)
    grid_n = Op // TN

    const_mode = pl.Buffered(1)                     # fetched once, no 2nd buffer
    cls_mode = const_mode if grid_n == 1 else None  # C/bias constant iff 1 tile

    compiler_kwargs = dict(dimension_semantics=("parallel", "arbitrary"))
    if step_bytes(TB) > 12 * 1024 * 1024:           # raise the cap only if needed
        compiler_kwargs["vmem_limit_bytes"] = vmem_limit

    out = pl.pallas_call(
        _nd_head_kernel,
        out_shape=jax.ShapeDtypeStruct((Bp, Op), cdt),
        grid=(grid_b, grid_n),
        in_specs=[
            # x: block index constant along the inner class axis -> fetched
            # once per batch tile (batch is the OUTER grid axis).
            pl.BlockSpec((TB, D), lambda i, j: (i, 0)),
            pl.BlockSpec((D, Rp), lambda i, j: (0, 0), pipeline_mode=const_mode),
            pl.BlockSpec((Rp, TN), lambda i, j: (0, j), pipeline_mode=cls_mode),
            pl.BlockSpec((1, TN), lambda i, j: (0, j), pipeline_mode=cls_mode),
        ],
        out_specs=pl.BlockSpec((TB, TN), lambda i, j: (i, j)),
        scratch_shapes=[pltpu.VMEM((TB, Rp), cdt)],
        compiler_params=pltpu.CompilerParams(**compiler_kwargs),
        cost_estimate=pl.CostEstimate(
            flops=2 * grid_b * TB * Rp * (D + Op),
            transcendentals=0,
            bytes_accessed=(Bp * D + D * Rp) * itemsize
            + grid_b * (Rp * Op * itemsize + Op * 4)
            + grid_b * TB * Op * out_itemsize,
        ),
    )(xp, a_pad, c_pad, b_pad)

    return out[:B, :O]


def init_params(key, input_dim, output_dim):
    """Deterministic synthetic init matching the module's parameter shapes."""
    D1 = input_dim // 8
    H1, H2 = 2, 2
    ks = jax.random.split(key, 6)

    def lin(kw, kb, out_f, in_f):
        bound = float(in_f) ** -0.5
        w = jax.random.uniform(kw, (out_f, in_f), jnp.float32, -bound, bound)
        b = jax.random.uniform(kb, (out_f,), jnp.float32, -bound, bound)
        return w, b

    w1, b1 = lin(ks[0], ks[1], H1, D1)                 # NdLinear align_layers[0]
    w2, b2 = lin(ks[2], ks[3], H2, 8)                  # NdLinear align_layers[1]
    w3, b3 = lin(ks[4], ks[5], output_dim, H1 * H2)    # nn.Linear(4, output_dim)
    return w1, b1, w2, b2, w3, b3


def reference(x, params):
    """Pure-JAX reference reproducing the PyTorch forward semantics."""
    w1, b1, w2, b2, w3, b3 = params
    B, input_dim = x.shape
    x3 = x.reshape(B, input_dim // 8, 8)
    y = jnp.einsum('bdk,hd->bhk', x3, w1) + b1[None, :, None]   # (B, H1, 8)
    z = jnp.einsum('bhk,gk->bhg', y, w2) + b2[None, None, :]    # (B, H1, H2)
    zf = z.reshape(B, -1)                                       # (B, H1*H2)
    return zf @ w3.T + b3[None, :]


if __name__ == "__main__":
    key = jax.random.PRNGKey(0)
    kx, kp = jax.random.split(key)

    B, input_dim, output_dim = 2, 32, 4
    x = jax.random.normal(kx, (B, input_dim), jnp.float32)
    params = init_params(kp, input_dim, output_dim)
    ref = reference(x, params)

    # f32 activations (matches the PyTorch module's default dtype exactly).
    out = jax.block_until_ready(nd_classification_head(x, params))
    assert out.shape == (B, output_dim)
    assert out.dtype == x.dtype
    # Rank-factored GEMM differs from the chained reference only by FP
    # reassociation.
    assert jnp.allclose(out, ref, atol=2e-5, rtol=1e-5), (out, ref)

    # bf16 activation streaming path (weights cast to the activation dtype in
    # the wrapper; accumulation stays f32, bias add f32, output bf16).
    out_bf16 = jax.block_until_ready(
        nd_classification_head(x.astype(jnp.bfloat16), params))
    assert out_bf16.shape == (B, output_dim)
    assert out_bf16.dtype == jnp.bfloat16
    assert jnp.allclose(out_bf16.astype(jnp.float32), ref, atol=6e-2, rtol=6e-2)

    print("KERNEL_OK")
</pallas_src>

<mosaic_0001>
module attributes {stable_mosaic.version = 11 : i64} {
  func.func @_nd_head_kernel(%arg0: i32, %arg1: i32, %arg2: memref<8x32xf32, #tpu.memory_space<vmem>>, %arg3: memref<32x128xf32, #tpu.memory_space<vmem>>, %arg4: memref<128x128xf32, #tpu.memory_space<vmem>>, %arg5: memref<1x128xf32, #tpu.memory_space<vmem>>, %arg6: memref<8x128xf32, #tpu.memory_space<vmem>>, %arg7: memref<8x128xf32, #tpu.memory_space<vmem>>) attributes {dimension_semantics = [#tpu.dimension_semantics<parallel>, #tpu.dimension_semantics<arbitrary>], iteration_bounds = array<i64: 1, 1>, scalar_prefetch = 0 : i64, scratch_operands = 1 : i64, tpu.core_type = #tpu.core_type<tc>, window_params = [{transform_indices = @transform_0, window_bounds = array<i64: 8, 32>}, {pipeline_mode = #tpu.pipeline_mode<synchronous>, transform_indices = @transform_1, window_bounds = array<i64: 32, 128>}, {pipeline_mode = #tpu.pipeline_mode<synchronous>, transform_indices = @transform_2, window_bounds = array<i64: 128, 128>}, {pipeline_mode = #tpu.pipeline_mode<synchronous>, transform_indices = @transform_3, window_bounds = array<i64: 1, 128>}, {transform_indices = @transform_4, window_bounds = array<i64: 8, 128>}]} {
    %c0_i32 = arith.constant 0 : i32
    %0 = arith.cmpi eq, %arg1, %c0_i32 : i32
    %1 = arith.extui %0 : i1 to i32
    %c0_i32_0 = arith.constant 0 : i32
    %2 = arith.cmpi ne, %1, %c0_i32_0 : i32
    scf.if %2 {
      %c0_8 = arith.constant 0 : index
      %c0_9 = arith.constant 0 : index
      %10 = vector.load %arg2[%c0_8, %c0_9] : memref<8x32xf32, #tpu.memory_space<vmem>>, vector<8x32xf32>
      %c0_10 = arith.constant 0 : index
      %c0_11 = arith.constant 0 : index
      %11 = vector.load %arg3[%c0_10, %c0_11] : memref<32x128xf32, #tpu.memory_space<vmem>>, vector<32x128xf32>
      %cst_12 = arith.constant dense<0.000000e+00> : vector<8x128xf32>
      %12 = tpu.matmul %10, %11, %cst_12 {dimension_numbers = #tpu.dot_dimension_numbers<[1], [0], [0], [1], [0, 0, 1, 1], [], []>} : vector<8x32xf32>, vector<32x128xf32>, vector<8x128xf32> -> vector<8x128xf32>
      %c0_13 = arith.constant 0 : index
      %c0_14 = arith.constant 0 : index
      %13 = vector.load %arg7[%c0_13, %c0_14] : memref<8x128xf32, #tpu.memory_space<vmem>>, vector<8x128xf32>
      tpu.vector_store %arg7[%c0_13, %c0_14], %12 {strides = array<i32>} : memref<8x128xf32, #tpu.memory_space<vmem>>, vector<8x128xf32>,
    } else {
    }
    %c0 = arith.constant 0 : index
    %c0_1 = arith.constant 0 : index
    %3 = vector.load %arg7[%c0, %c0_1] : memref<8x128xf32, #tpu.memory_space<vmem>>, vector<8x128xf32>
    %c0_2 = arith.constant 0 : index
    %c0_3 = arith.constant 0 : index
    %4 = vector.load %arg4[%c0_2, %c0_3] : memref<128x128xf32, #tpu.memory_space<vmem>>, vector<128x128xf32>
    %cst = arith.constant dense<0.000000e+00> : vector<8x128xf32>
    %5 = tpu.matmul %3, %4, %cst {dimension_numbers = #tpu.dot_dimension_numbers<[1], [0], [0], [1], [0, 0, 1, 1], [], []>} : vector<8x128xf32>, vector<128x128xf32>, vector<8x128xf32> -> vector<8x128xf32>
    %c0_4 = arith.constant 0 : index
    %c0_5 = arith.constant 0 : index
    %6 = vector.load %arg5[%c0_4, %c0_5] : memref<1x128xf32, #tpu.memory_space<vmem>>, vector<1x128xf32>
    %7 = vector.broadcast %6 : vector<1x128xf32> to vector<8x128xf32>
    %8 = arith.addf %5, %7 : vector<8x128xf32>
    %c0_6 = arith.constant 0 : index
    %c0_7 = arith.constant 0 : index
    %9 = vector.load %arg6[%c0_6, %c0_7] : memref<8x128xf32, #tpu.memory_space<vmem>>, vector<8x128xf32>
    tpu.vector_store %arg6[%c0_6, %c0_7], %8 {strides = array<i32>} : memref<8x128xf32, #tpu.memory_space<vmem>>, vector<8x128xf32>,
    return
  }
  func.func @transform_0(%arg0: i32, %arg1: i32) -> (i32, i32) {
    %c0_i32 = arith.constant 0 : i32
    %c0_i32_0 = arith.constant 0 : i32
    return %arg0, %c0_i32 : i32, i32
  }
  func.func @transform_1(%arg0: i32, %arg1: i32) -> (i32, i32) {
    %c0_i32 = arith.constant 0 : i32
    %c0_i32_0 = arith.constant 0 : i32
    %c0_i32_1 = arith.constant 0 : i32
    return %c0_i32, %c0_i32_0 : i32, i32
  }
  func.func @transform_2(%arg0: i32, %arg1: i32) -> (i32, i32) {
    %c0_i32 = arith.constant 0 : i32
    %c0_i32_0 = arith.constant 0 : i32
    return %c0_i32, %arg1 : i32, i32
  }
  func.func @transform_3(%arg0: i32, %arg1: i32) -> (i32, i32) {
    %c0_i32 = arith.constant 0 : i32
    %c0_i32_0 = arith.constant 0 : i32
    return %c0_i32, %arg1 : i32, i32
  }
  func.func @transform_4(%arg0: i32, %arg1: i32) -> (i32, i32) {
    %c0_i32 = arith.constant 0 : i32
    return %arg0, %arg1 : i32, i32
  }
}

</mosaic_0001>

<bundles_post_ra>
// kernel: tpu_custom_call.1
= control target key start
LH: loop header
LB: loop body
LE: loop exit
PB: predicated region body
PF: predicated region fallthrough
CT: control target
= control target key end

     0   :  { %9 = vsyncpa [#allocation4], 0  ;;  %s546_s0 = inlined_call_operand.hbm [shape: f32[8,32], index: 0, kind: input, shape index: {}]   ;;  %s547_s1 = inlined_call_operand.hbm [shape: f32[32,128], index: 1, kind: input, shape index: {}]   ;;  %s548_s2 = inlined_call_operand.hbm [shape: f32[128,128], index: 2, kind: input, shape index: {}]   ;;  %s549_s3 = inlined_call_operand.vmem [shape: f32[1,128], index: 3, kind: input, shape index: {}]   ;;  %s550_s4 = inlined_call_operand.hbm [shape: f32[8,128], index: 4, kind: output, shape index: {}]  }
   0x1   :  { %10 = vsyncpa [#allocation7], 0 }
   0x2   :  { %11 = vsyncpa [#allocation5], 0  ;;  %s455_s15 = smov [#allocation6]   ;;  %s361_s19 = scalar_lea.hbm %s547_s1, 512 }
   0x3   :  { %s27_s16 = sshll.u32 %s455_s15, 4  ;;  %p362_p0 = scmp.ne.s32.totalorder %s547_s1, %s361_s19  ;;  %s28_s16 = int_to_ptr.vmem [resolvable:$true] %s27_s16 }
   0x4   :  { %p365_p1 = scmp.lt.u32.totalorder %s361_s19, %s547_s1 }
   0x6   :  { %p367_p2 = pnand %p365_p1, %p362_p0 }
   0x8   :  { %370 = shalt.err (!%p367_p2)
}
   0x9   :  { %s371_s24 = scalar_lea.vmem %s28_s16, 512  ;;  %p376_p4 = scmp.lt.s32.totalorder %s28_s16, %s28_s16 }
   0xa   :  { %p372_p3 = scmp.ne.s32.totalorder %s28_s16, %s371_s24  ;;  %p377_p5 = scmp.lt.s32.totalorder %s371_s24, %s371_s24 }
   0xc   :  { %p378_p6 = por %p377_p5, %p376_p4 }
   0xe   :  { %p379_p7 = pnand %p378_p6, %p372_p3 }
  0x10   :  { %382 = shalt.err (!%p379_p7)
}
  0x11   :  { %s456_s25 = smov 128   ;;  %s457_s26 = smov 8  }
  0x12   :  { %33 = dma.hbm_to_vmem [thread:$0]  %s547_s1, 512, %s28_s16, [#allocation7], %s456_s25, %s456_s25, %s457_s26  }
  0x13   :  { %s458_s29 = smov [#allocation3]   ;;  %s459_s5 = smov [#allocation8]  }
  0x14   :  { %s18_s30 = sshll.u32 %s458_s29, 4  ;;  %s39_s6 = sshll.u32 %s459_s5, 4  ;;  %s19_s30 = int_to_ptr.vmem [resolvable:$true] %s18_s30  ;;  %s40_s6 = int_to_ptr.vmem [resolvable:$true] %s39_s6 }
  0x15   :  { %s383_s9 = scalar_lea.hbm %s546_s0, 128 }
  0x16   :  { %p384_p8 = scmp.ne.s32.totalorder %s546_s0, %s383_s9  ;;  %p387_p9 = scmp.lt.u32.totalorder %s383_s9, %s546_s0 }
  0x18   :  { %p389_p10 = pnand %p387_p9, %p384_p8 }
  0x1a   :  { %392 = shalt.err (!%p389_p10)
}
  0x1b   :  { %s393_s1 = scalar_lea.vmem %s19_s30, 128  ;;  %p398_p12 = scmp.lt.s32.totalorder %s19_s30, %s19_s30 }
  0x1c   :  { %p394_p11 = scmp.ne.s32.totalorder %s19_s30, %s393_s1  ;;  %p399_p13 = scmp.lt.s32.totalorder %s393_s1, %s393_s1 }
  0x1e   :  { %p400_p0 = por %p399_p13, %p398_p12 }
  0x20   :  { %p401_p1 = pnand %p400_p0, %p394_p11 }
  0x22   :  { %404 = shalt.err (!%p401_p1)
}
  0x23   :  { %21 = dma.hbm_to_vmem [thread:$0]  %s546_s0, 128, %s19_s30, [#allocation4]  }
  0x24   :  { %s405_s18 = scalar_lea.hbm %s548_s2, 2048 }
  0x25   :  { %p406_p2 = scmp.ne.s32.totalorder %s548_s2, %s405_s18  ;;  %p409_p3 = scmp.lt.u32.totalorder %s405_s18, %s548_s2 }
  0x27   :  { %p411_p4 = pnand %p409_p3, %p406_p2 }
  0x29   :  { %414 = shalt.err (!%p411_p4)
}
  0x2a   :  { %s415_s23 = scalar_lea.vmem %s40_s6, 2048  ;;  %p420_p6 = scmp.lt.s32.totalorder %s40_s6, %s40_s6 }
  0x2b   :  { %p416_p5 = scmp.ne.s32.totalorder %s40_s6, %s415_s23  ;;  %p421_p7 = scmp.lt.s32.totalorder %s415_s23, %s415_s23 }
  0x2d   :  { %p422_p8 = por %p421_p7, %p420_p6 }
  0x2f   :  { %p423_p9 = pnand %p422_p8, %p416_p5 }
  0x31   :  { %426 = shalt.err (!%p423_p9)
}
  0x32   :  { %45 = dma.hbm_to_vmem [thread:$0]  %s548_s2, 2048, %s40_s6, [#allocation7], %s456_s25, %s456_s25, %s457_s26  }
  0x33   :  { %449 = dma.done.wait [#allocation4], 128  }
  0x34   :  { %450 = vsyncadd [#allocation4], 4294967168 }
  0x35   :  { %451 = dma.done.wait [#allocation7], 2560  }
  0x36   :  { %452 = vsyncadd [#allocation7], 4294964736  ;;  %v460_v0 = vmov 0.0|0.0   ;;  %vm461_vm0 = vmmov 0   ;;  %v462_v1 = vmov 0.0   ;;  %v62_v2 = vld [vmem:[#allocation6] sm:$0xff] }
  0x37   :  { %322 = vmatprep.subr.bf16.mxu0 %v460_v0  ;;  %284 = vmatprep.mubr.msk.f32.mxu0 %vm461_vm0, %v462_v1  ;;  %v63_v3 = vld [vmem:[#allocation6 + $0x8] sm:$0xff]  ;;  %v64_v4 = vld [vmem:[#allocation6 + $0x10] sm:$0xff]  ;;  %v65_v6 = vld [vmem:[#allocation6 + $0x18] sm:$0xff]  ;;  %vm66_vm1 = vcmask 261120   ;;  %s463_s26 = smov [#allocation9]  }
  0x38   :  { %328 = vmatprep.subr.bf16.mxu1 %v460_v0  ;;  %319 = vmatprep.mubr.msk.f32.mxu1 %vm461_vm0, %v462_v1  ;;  %v323_v5 = vpack.c.bf16 %v63_v3, %v62_v2  ;;  %v142_v7 = vld [vmem:[#allocation8] sm:$0xff]  ;;  %v143_v8 = vld [vmem:[#allocation8 + $0x8] sm:$0xff]  ;;  %v144_v9 = vld [vmem:[#allocation8 + $0x10] sm:$0xff]  ;;  %v326_v11 = vpack.c.bf16 %v65_v6, %v64_v4  ;;  %s242_s27 = sshll.u32 %s463_s26, 4  ;;  %s243_s27 = int_to_ptr.vmem [resolvable:$true] %s242_s27 }
  0x39   :  { %v145_v10 = vld [vmem:[#allocation8 + $0x18] sm:$0xff]  ;;  %v329_v12 = vpack.c.bf16 %v143_v8, %v142_v7  ;;  %v146_v14 = vld [vmem:[#allocation8 + $0x20] sm:$0xff]  ;;  %v147_v15 = vld [vmem:[#allocation8 + $0x28] sm:$0xff]  ;;  %s427_s28 = scalar_lea.vmem %s243_s27, 128  ;;  %p432_p11 = scmp.lt.s32.totalorder %s243_s27, %s243_s27 }
  0x3a   :  { %324 = vmatpush3.bf16.msra.mxu0 %v323_v5  ;;  %v332_v13 = vpack.c.bf16 %v145_v10, %v144_v9  ;;  %v61_v16 = vld [vmem:[#allocation3] sm:$0xff]  ;;  %v335_v17 = vpack.c.bf16 %v147_v15, %v146_v14  ;;  %v148_v18 = vld [vmem:[#allocation8 + $0x30] sm:$0xff]  ;;  %v150_v21 = vld [vmem:[#allocation8 + $0x40] sm:$0xff]  ;;  %p428_p10 = scmp.ne.s32.totalorder %s243_s27, %s427_s28  ;;  %p433_p12 = scmp.lt.s32.totalorder %s427_s28, %s427_s28 }
  0x3b   :  { %325 = vmatprep.subr.bf16.mxu0 %v460_v0  ;;  %330 = vmatpush3.bf16.msra.mxu1 %v329_v12  ;;  %v149_v19 = vld [vmem:[#allocation8 + $0x38] sm:$0xff]  ;;  %v151_v22 = vld [vmem:[#allocation8 + $0x48] sm:$0xff]  ;;  %v152_v24 = vld [vmem:[#allocation8 + $0x50] sm:$0xff] }
  0x3c   :  { %331 = vmatprep.subr.bf16.mxu1 %v460_v0  ;;  %v338_v20 = vpack.c.bf16 %v149_v19, %v148_v18  ;;  %v341_v23 = vpack.c.bf16 %v151_v22, %v150_v21  ;;  %v153_v25 = vld [vmem:[#allocation8 + $0x58] sm:$0xff]  ;;  %v154_v27 = vld [vmem:[#allocation8 + $0x60] sm:$0xff]  ;;  %v155_v28 = vld [vmem:[#allocation8 + $0x68] sm:$0xff]  ;;  %p434_p13 = por %p433_p12, %p432_p11 }
  0x3d   :  { %v344_v26 = vpack.c.bf16 %v153_v25, %v152_v24  ;;  %v347_v29 = vpack.c.bf16 %v155_v28, %v154_v27  ;;  %v156_v30 = vld [vmem:[#allocation8 + $0x70] sm:$0xff]  ;;  %v157_v31 = vld [vmem:[#allocation8 + $0x78] sm:$0xff] }
  0x3e   :  { %327 = vmatpush3.bf16.msra.mxu0 %v326_v11  ;;  %v350_v32 = vpack.c.bf16 %v157_v31, %v156_v30  ;;  %v253_v35 = vld [vmem:[%s549_s3] ss:$0 sm:$0xff]  ;;  %p435_p0 = pnand %p434_p13, %p428_p10 }
  0x3f   :  { %333 = vmatpush3.bf16.msra.mxu1 %v332_v13 }
  0x40   :  { %334 = vmatprep.subr.bf16.mxu1 %v460_v0 }
  0x41   :  { %285 = vmatmul.mubr.msk.f32.vlgmr.msra.gmra.mrb[0].mxu0 %vm66_vm1, %v61_v16 }
  0x43   :  { %336 = vmatpush3.bf16.msra.mxu1 %v335_v17 }
  0x44   :  { %337 = vmatprep.subr.bf16.mxu1 %v460_v0 }
  0x47   :  { %339 = vmatpush3.bf16.msra.mxu1 %v338_v20 }
  0x48   :  { %340 = vmatprep.subr.bf16.mxu1 %v460_v0 }
  0x4b   :  { %342 = vmatpush3.bf16.msra.mxu1 %v341_v23 }
  0x4c   :  { %343 = vmatprep.subr.bf16.mxu1 %v460_v0 }
  0x4f   :  { %345 = vmatpush3.bf16.msra.mxu1 %v344_v26 }
  0x50   :  { %346 = vmatprep.subr.bf16.mxu1 %v460_v0 }
  0x53   :  { %348 = vmatpush3.bf16.msra.mxu1 %v347_v29 }
  0x54   :  { %349 = vmatprep.subr.bf16.mxu1 %v460_v0 }
  0x57   :  { %351 = vmatpush3.bf16.msra.mxu1 %v350_v32 }
 0x114   :  { %v136_v33 = vpop.f32.mrb[0].mxu0 }
 0x115   :  { %v286_v34 = vpop.f32.mrb[1].mxu0  ;;  %320 = vmatmul.mubr.f32.vlgmr.msra.gmra.mrb[0].mxu1 %v136_v33 }
 0x1e8   :  { %v231_v36 = vpop.f32.mrb[0].mxu1 }
 0x1e9   :  { %v232_v37 = vadd.f32 %v253_v35, %v231_v36  ;;  %v321_v38 = vpop.f32.mrb[1].mxu1 }
 0x1eb   :  { %235 = vst [vmem:[#allocation9] sm:$0xff] %v232_v37 }
 0x1ec   :  { %438 = shalt.err (!%p435_p0)
}
 0x1ed   :  { %s439_s5 = scalar_lea.hbm %s550_s4, 128 }
 0x1ee   :  { %p440_p1 = scmp.ne.s32.totalorder %s550_s4, %s439_s5  ;;  %p443_p2 = scmp.lt.u32.totalorder %s439_s5, %s550_s4 }
 0x1f0   :  { %p445_p3 = pnand %p443_p2, %p440_p1 }
 0x1f2   :  { %448 = shalt.err (!%p445_p3)
}
 0x1f3   :  { %245 = dma.vmem_to_hbm [thread:$0]  %s243_s27, 128, %s550_s4, [#allocation5]  }
 0x1f4   :  { %453 = dma.done.wait [#allocation5], 128  }
 0x1f5   :  { %454 = vsyncadd [#allocation5], 4294967168 }
 0x1f6   :  { %249 = vsyncpa [#allocation4], 1 }
 0x1f7   :  { %250 = vsyncpa [#allocation7], 1 }
 0x1f8   :  { %251 = vsyncpa [#allocation5], 1 }

</bundles_post_ra>
